<compile_context>
chip_gen: v7x
topology: tpu7x:2x2x1
jax: 0.10.0
libtpu: 0.0.40
codegen_flags: <defaults>
</compile_context>

<pallas_src>
import functools

import jax
import jax.numpy as jnp
from jax.experimental import pallas as pl
from jax.experimental.pallas import tpu as pltpu

GAMMA = 1  # module default (static integer exponent)


def _focal_ce_partial_kernel(x_ref, t_ref, partial_ref, *, n_total, tn, needs_mask):
    """Per-tile partial sum of cross-entropy.

    x_ref:       (TN, C) logits tile in VMEM (any float dtype)
    t_ref:       (TN, 1) int32 targets tile in VMEM
    partial_ref: (1, 1) f32 per-tile CE sum in SMEM
    """
    x = x_ref[...].astype(jnp.float32)                      # (TN, C)
    t = t_ref[...]                                          # (TN, 1) int32
    rows, c = x.shape

    # Numerically stable log-sum-exp over the class dim.
    m = jnp.max(x, axis=-1, keepdims=True)                  # (TN, 1)
    z = x - m                                               # (TN, C)
    lse = jnp.log(jnp.sum(jnp.exp(z), axis=-1, keepdims=True))  # (TN, 1)

    # Gather z[target] via iota-compare select; ce = lse - z[target]
    # (== -log_softmax(x)[target]).  log_probs is never materialized.
    cls = jax.lax.broadcasted_iota(jnp.int32, (rows, c), 1)     # (TN, C)
    gathered = jnp.sum(jnp.where(cls == t, z, 0.0), axis=-1,
                       keepdims=True)                            # (TN, 1)
    ce = lse - gathered                                          # (TN, 1)

    if needs_mask:
        # Mask pad rows of the final (partial) tile so they contribute 0.
        row = (pl.program_id(0) * tn
               + jax.lax.broadcasted_iota(jnp.int32, (rows, 1), 0))
        ce = jnp.where(row < n_total, ce, 0.0)

    partial_ref[0, 0] = jnp.sum(ce)


def focal_loss1(logits, targets, *, tn=512):
    """logits: (N, C) float; targets: (N,) int class indices. Returns scalar f32.

    tn: batch-tile size.  ~512 rows hits ~85% of HBM roofline; on v7x (64 MiB
    VMEM) keep 2 * tn * C * itemsize well under the scoped VMEM limit.
    """
    n, c = logits.shape
    tn = min(tn, n)
    if tn != n:
        tn = max(8, (tn // 8) * 8)          # keep the sublane dim a multiple of 8
    num_tiles = (n + tn - 1) // tn
    t2 = targets.astype(jnp.int32).reshape(n, 1)

    kernel = functools.partial(
        _focal_ce_partial_kernel,
        n_total=n, tn=tn, needs_mask=(n % tn != 0))

    partials = pl.pallas_call(
        kernel,
        out_shape=jax.ShapeDtypeStruct((num_tiles, 1), jnp.float32),
        grid=(num_tiles,),
        in_specs=[
            # Full C per tile.
            # TODO(synk): for vocab-scale C add a second grid axis over C with
            # online-softmax accumulation instead of requiring full C in VMEM.
            pl.BlockSpec((tn, c), lambda i: (i, 0)),
            pl.BlockSpec((tn, 1), lambda i: (i, 0)),
        ],
        out_specs=pl.BlockSpec((1, 1), lambda i: (i, 0),
                               memory_space=pltpu.SMEM),
        compiler_params=pltpu.CompilerParams(
            # Independent per-tile partials -> shard grid across both TCs on v7x.
            dimension_semantics=("parallel",)),
    )(logits, t2)

    # Tiny JAX epilogue: mean over the true N, then focal transform (gamma=1).
    logp = jnp.sum(partials) / jnp.float32(n)
    p = jnp.exp(-logp)
    loss = (1.0 - p) * logp
    return 10.0 * loss


def _ref_focal_loss1(logits, targets):
    """Pure-JAX reference mirroring the PyTorch module."""
    lp = jax.nn.log_softmax(logits.astype(jnp.float32), axis=-1)
    ce = -jnp.take_along_axis(lp, targets[:, None].astype(jnp.int32), axis=-1)[:, 0]
    logp = jnp.mean(ce)
    p = jnp.exp(-logp)
    return 10.0 * ((1.0 - p) ** GAMMA * logp)


if __name__ == "__main__":
    key = jax.random.PRNGKey(0)
    k1, k2, k3, k4 = jax.random.split(key, 4)

    # Small shapes consistent with the module's 2-D CE input: (N, C) logits.
    N, C = 8, 32
    logits = jax.random.normal(k1, (N, C), dtype=jnp.float32)
    targets = jax.random.randint(k2, (N,), 0, C, dtype=jnp.int32)

    out = focal_loss1(logits, targets)
    jax.block_until_ready(out)
    ref = _ref_focal_loss1(logits, targets)
    assert jnp.allclose(out, ref, rtol=1e-5, atol=1e-5), (out, ref)

    # Also exercise the multi-tile path with a masked partial final tile.
    N2, C2 = 200, 128
    logits2 = jax.random.normal(k3, (N2, C2), dtype=jnp.float32)
    targets2 = jax.random.randint(k4, (N2,), 0, C2, dtype=jnp.int32)
    out2 = focal_loss1(logits2, targets2, tn=64)
    jax.block_until_ready(out2)
    ref2 = _ref_focal_loss1(logits2, targets2)
    assert jnp.allclose(out2, ref2, rtol=1e-5, atol=1e-5), (out2, ref2)

    print("KERNEL_OK")
</pallas_src>

<mosaic_0001>
module attributes {stable_mosaic.version = 11 : i64} {
  func.func @_focal_ce_partial_kernel(%arg0: i32, %arg1: memref<8x32xf32, #tpu.memory_space<vmem>>, %arg2: memref<8x1xi32, #tpu.memory_space<vmem>>, %arg3: memref<1x1xf32, #tpu.memory_space<smem>>) attributes {dimension_semantics = [#tpu.dimension_semantics<parallel>], iteration_bounds = array<i64: 1>, scalar_prefetch = 0 : i64, scratch_operands = 0 : i64, tpu.core_type = #tpu.core_type<tc>, window_params = [{transform_indices = @transform_0, window_bounds = array<i64: 8, 32>}, {transform_indices = @transform_1, window_bounds = array<i64: 8, 1>}, {transform_indices = @transform_2, window_bounds = array<i64: 1, 1>}]} {
    %c0 = arith.constant 0 : index
    %c0_0 = arith.constant 0 : index
    %0 = vector.load %arg1[%c0, %c0_0] : memref<8x32xf32, #tpu.memory_space<vmem>>, vector<8x32xf32>
    %c0_1 = arith.constant 0 : index
    %c0_2 = arith.constant 0 : index
    %1 = vector.load %arg2[%c0_1, %c0_2] : memref<8x1xi32, #tpu.memory_space<vmem>>, vector<8x1xi32>
    %cst = arith.constant dense<0xFF800000> : vector<8xf32>
    %2 = vector.multi_reduction <maximumf>, %0, %cst [1] : vector<8x32xf32> to vector<8xf32>
    %3 = vector.shape_cast %2 : vector<8xf32> to vector<8x1xf32>
    %4 = vector.broadcast %3 : vector<8x1xf32> to vector<8x32xf32>
    %5 = arith.subf %0, %4 : vector<8x32xf32>
    %6 = math.exp %5 : vector<8x32xf32>
    %cst_3 = arith.constant dense<0.000000e+00> : vector<8xf32>
    %7 = vector.multi_reduction <add>, %6, %cst_3 [1] : vector<8x32xf32> to vector<8xf32>
    %8 = vector.shape_cast %7 : vector<8xf32> to vector<8x1xf32>
    %9 = math.log %8 : vector<8x1xf32>
    %10 = tpu.iota {dimensions = array<i32: 1>} : vector<8x32xi32>
    %11 = vector.broadcast %1 : vector<8x1xi32> to vector<8x32xi32>
    %12 = arith.cmpi eq, %10, %11 : vector<8x32xi32>
    %cst_4 = arith.constant 0.000000e+00 : f32
    %13 = vector.broadcast %cst_4 : f32 to vector<8x32xf32>
    %14 = arith.select %12, %5, %13 : vector<8x32xi1>, vector<8x32xf32>
    %cst_5 = arith.constant dense<0.000000e+00> : vector<8xf32>
    %15 = vector.multi_reduction <add>, %14, %cst_5 [1] : vector<8x32xf32> to vector<8xf32>
    %16 = vector.shape_cast %15 : vector<8xf32> to vector<8x1xf32>
    %17 = arith.subf %9, %16 : vector<8x1xf32>
    %18 = vector.shape_cast %17 : vector<8x1xf32> to vector<1x8x1xf32>
    %cst_6 = arith.constant dense<0.000000e+00> : vector<1xf32>
    %19 = vector.multi_reduction <add>, %18, %cst_6 [1, 2] : vector<1x8x1xf32> to vector<1xf32>
    %20 = vector.shape_cast %19 : vector<1xf32> to vector<1x1x1xf32>
    %21 = vector.extract %20[0, 0, 0] : f32 from vector<1x1x1xf32>
    %c0_7 = arith.constant 0 : index
    %c0_8 = arith.constant 0 : index
    %22 = memref.load %arg3[%c0_7, %c0_8] : memref<1x1xf32, #tpu.memory_space<smem>>
    memref.store %21, %arg3[%c0_7, %c0_8] : memref<1x1xf32, #tpu.memory_space<smem>>
    return
  }
  func.func @transform_0(%arg0: i32) -> (i32, i32) {
    %c0_i32 = arith.constant 0 : i32
    %c0_i32_0 = arith.constant 0 : i32
    return %arg0, %c0_i32 : i32, i32
  }
  func.func @transform_1(%arg0: i32) -> (i32, i32) {
    %c0_i32 = arith.constant 0 : i32
    %c0_i32_0 = arith.constant 0 : i32
    return %arg0, %c0_i32 : i32, i32
  }
  func.func @transform_2(%arg0: i32) -> (i32, i32) {
    %c0_i32 = arith.constant 0 : i32
    %c0_i32_0 = arith.constant 0 : i32
    return %arg0, %c0_i32 : i32, i32
  }
}

</mosaic_0001>

<bundles_post_ra>
// kernel: tpu_custom_call.1
= control target key start
LH: loop header
LB: loop body
LE: loop exit
PB: predicated region body
PF: predicated region fallthrough
CT: control target
= control target key end

     0   :  { %vm14_vm0 = vcmask 261120   ;;  %s122_s0 = inlined_call_operand.vmem [shape: f32[8,32], index: 0, kind: input, shape index: {}]   ;;  %s123_s1 = inlined_call_operand.vmem [shape: s32[8,1], index: 1, kind: input, shape index: {}]   ;;  %s124_s2 = inlined_call_operand.hbm [shape: f32[1,1], index: 2, kind: output, shape index: {}]  }
   0x1   :  { %v12_v0 = vld [vmem:[%s122_s0] sm:$0xff] }
   0x2   :  { %7 = vsyncpa [#allocation3], 0  ;;  %v15_v1 = vsel %vm14_vm0, %v12_v0, -inf  ;;  %v84_v2 = vmov 0   ;;  %v13_v3 = vld [vmem:[%s123_s1] sm:$0xff]  ;;  %v26_v7 = vlaneseq  ;;  %vm37_vm2 = vcmask 7168  }
   0x3   :  { %67 = vset.pattern.permute.xlu0 %v84_v2  ;;  %s72_s14 = scalar_lea.hbm %s124_s2, 16 }
   0x4   :  { %16 = vmax.xlane.f32.xlu0 %v15_v1  ;;  %v27_v8 = vand.u32 127, %v26_v7  ;;  %p73_p0 = scmp.ne.s32.totalorder %s124_s2, %s72_s14  ;;  %p76_p1 = scmp.lt.u32.totalorder %s72_s14, %s124_s2 }
   0x6   :  { %p78_p2 = pnand %p76_p1, %p73_p0 }
  0x1a   :  { %29 = vperm.xlu0 %67, %v13_v3  }
  0x91   :  { %v17_v4 = vpop.xlane.xlu0 %16 }
  0x92   :  { %v18_v5 = vsub.f32 %v12_v0, %v17_v4 }
  0x94   :  { %v19_v6 = vmul.f32 1.442695, %v18_v5 }
  0x96   :  { %68 = vpow2.f32 %v19_v6 }
  0x99   :  { %v30_v9 = vpop.permute.xlu0 %29 }
  0x9a   :  { %vm31_vm1 = vcmp.eq.s32.totalorder %v27_v8, %v30_v9 }
  0x9b   :  { %v32_v12 = vsel %vm31_vm1, %v18_v5, 0.0 }
  0x9c   :  { %v33_v13 = vsel %vm14_vm0, %v32_v12, 0.0 }
  0xa0   :  { %v69_v10 = vpop.eup %68 }
  0xa1   :  { %v21_v11 = vsel %vm14_vm0, %v69_v10, 0.0 }
  0xa2   :  { %22 = vadd.xlane.f32.xlu1 %v21_v11 }
  0xa6   :  { %34 = vadd.xlane.f32.xlu1 %v33_v13 }
 0x12f   :  { %v23_v14 = vpop.xlane.xlu1 %22 }
 0x130   :  { %70 = vlog2.f32 %v23_v14 }
 0x133   :  { %v35_v17 = vpop.xlane.xlu1 %34 }
 0x13a   :  { %v71_v15 = vpop.eup %70 }
 0x13b   :  { %v25_v16 = vmul.f32 0.6931472, %v71_v15 }
 0x13d   :  { %v36_v18 = vsub.f32 %v25_v16, %v35_v17 }
 0x13f   :  { %v38_v19 = vsel %vm37_vm2, %v36_v18, 0.0 }
 0x140   :  { %39 = vadd.xlane.f32.xlu1 %v38_v19 }
 0x1cd   :  { %v40_v20 = vpop.xlane.xlu1 %39 }
 0x1ce   :  { %v41_v21 = vrot.slane %v40_v20, 4 }
 0x1d0   :  { %v42_v22 = vadd.f32 %v41_v21, %v40_v20 }
 0x1d2   :  { %v43_v23 = vrot.slane %v42_v22, 2 }
 0x1d4   :  { %v44_v24 = vadd.f32 %v43_v23, %v42_v22 }
 0x1d6   :  { %v45_v25 = vrot.slane %v44_v24, 1 }
 0x1d8   :  { %v46_v26 = vadd.f32 %v45_v25, %v44_v24 }
 0x1da   :  { %63 = vpush %v46_v26 }
 0x20b   :  { %s64_s0 = spop %63 }
 0x20c   :  { %49 = sst [smem:[#allocation2]] %s64_s0 }
 0x20d   :  { %81 = shalt.err (!%p78_p2)
}
 0x20e   :  { %s85_s19 = smov [#allocation2]  }
 0x20f   :  { %57 = dma.smem_to_hbm %s85_s19, 16, %s124_s2, [#allocation3]  }
 0x210   :  { %82 = dma.done.wait [#allocation3], 16  }
 0x211   :  { %83 = vsyncadd [#allocation3], 4294967280 }
 0x212   :  { %61 = sfence }
 0x213   :  { %62 = vsyncpa [#allocation3], 1 }

</bundles_post_ra>
